<compile_context>
chip_gen: v7x
topology: tpu7x:2x2x1
jax: 0.10.0
libtpu: 0.0.40
codegen_flags: <defaults>
</compile_context>

<pallas_src>
import math

import jax
import jax.numpy as jnp
from jax.experimental import pallas as pl
from jax.experimental.pallas import tpu as pltpu

_INV_SQRT2 = 1.0 / math.sqrt(2.0)


def _pool_kernel(x_ref, sum_ref, acc_ref):
    """Accumulate the spatial sum of one (C, HW_tile) slab in f32 scratch."""
    t = pl.program_id(1)

    @pl.when(t == 0)
    def _():
        acc_ref[...] = jnp.zeros_like(acc_ref)

    x = x_ref[0]                                        # (C, HW_tile), HW on lanes
    acc_ref[...] += jnp.sum(x.astype(jnp.float32), axis=-1, keepdims=True)

    @pl.when(t == pl.num_programs(1) - 1)
    def _():
        sum_ref[0] = acc_ref[...]                       # (C, 1) f32 sum


def _gate_kernel(x_ref, s_ref, o_ref):
    """Streaming multiply: out = x * s; s broadcasts along the lane (HW) axis."""
    o_ref[0] = (x_ref[0] * s_ref[0]).astype(o_ref.dtype)


def _pick_hw_tile(HW, C, itemsize, target_bytes=2 << 20):
    """Largest HW tile that is a multiple of 128, divides HW, and keeps one
    (C, HW_tile) buffer under ~target_bytes.  Double-buffered in+out then stays
    well inside the default scoped VMEM on v5e (16 MiB) / v6e / v7x."""
    if HW % 128 != 0:
        return HW                      # small / odd spatial extents: whole slab
    max_lanes = max(128, (target_bytes // max(1, C * itemsize)) // 128 * 128)
    tile = min(HW, max_lanes)
    while HW % tile != 0:              # terminates: 128 always divides HW here
        tile -= 128
    return tile


def channel_attn_pallas(x_nchw, w1, b1, w2, b2):
    """x_nchw: (N, C, H, W).  w1: (C//2, C), b1: (C//2,), w2: (C, C//2),
    b2: (C,)  (PyTorch Conv2d 1x1 weights, squeezed to 2D)."""
    N, C, H, W = x_nchw.shape
    HW = H * W
    dtype = x_nchw.dtype
    itemsize = jnp.dtype(dtype).itemsize

    # NCHW -> (N, C, HW): contiguous reshape, no extra HBM pass.
    x = x_nchw.reshape(N, C, HW)

    hw_tile = _pick_hw_tile(HW, C, itemsize)
    n_tiles = HW // hw_tile

    # ---- Phase 1: tiled global average pool (f32 accumulation). -------------
    pooled_sum = pl.pallas_call(
        _pool_kernel,
        out_shape=jax.ShapeDtypeStruct((N, C, 1), jnp.float32),
        grid=(N, n_tiles),
        in_specs=[pl.BlockSpec((1, C, hw_tile), lambda n, t: (n, 0, t))],
        out_specs=pl.BlockSpec((1, C, 1), lambda n, t: (n, 0, 0)),
        scratch_shapes=[pltpu.VMEM((C, 1), jnp.float32)],
        compiler_params=pltpu.CompilerParams(
            dimension_semantics=("parallel", "arbitrary")),
        cost_estimate=pl.CostEstimate(
            flops=N * C * HW,
            transcendentals=0,
            bytes_accessed=N * C * HW * itemsize + N * C * 4),
    )(x)

    pooled = pooled_sum[:, :, 0] * (1.0 / HW)           # (N, C) f32 mean

    # ---- Tiny squeeze-excite MLP on (N, C): kept off the streaming path. ----
    h = pooled @ w1.T.astype(jnp.float32) + b1.astype(jnp.float32)   # (N, C//2)
    h = 0.5 * h * (1.0 + jax.lax.erf(h * _INV_SQRT2))                # exact GELU
    s = jax.nn.sigmoid(h @ w2.T.astype(jnp.float32) + b2.astype(jnp.float32))
    s = s.astype(dtype).reshape(N, C, 1)                             # (N, C, 1)

    # ---- Phase 2: lane-dense streaming gate out = x * s. --------------------
    out = pl.pallas_call(
        _gate_kernel,
        out_shape=jax.ShapeDtypeStruct((N, C, HW), dtype),
        grid=(N, n_tiles),
        in_specs=[
            pl.BlockSpec((1, C, hw_tile), lambda n, t: (n, 0, t)),
            pl.BlockSpec((1, C, 1), lambda n, t: (n, 0, 0)),
        ],
        out_specs=pl.BlockSpec((1, C, hw_tile), lambda n, t: (n, 0, t)),
        compiler_params=pltpu.CompilerParams(
            dimension_semantics=("parallel", "parallel")),
        cost_estimate=pl.CostEstimate(
            flops=N * C * HW,
            transcendentals=0,
            bytes_accessed=2 * N * C * HW * itemsize + N * C * itemsize),
    )(x, s)

    # (N, C, HW) -> NCHW: free contiguous reshape.
    return out.reshape(N, C, H, W)


def channel_attn_reference(x_nchw, w1, b1, w2, b2):
    """Pure-JAX reference mirroring the PyTorch module."""
    pooled = jnp.mean(x_nchw, axis=(2, 3))                     # (N, C)
    h = pooled @ w1.T + b1                                     # (N, C//2)
    h = 0.5 * h * (1.0 + jax.lax.erf(h * _INV_SQRT2))
    s = jax.nn.sigmoid(h @ w2.T + b2)                          # (N, C)
    return x_nchw * s[:, :, None, None]


if __name__ == "__main__":
    key = jax.random.PRNGKey(0)
    k_x, k_w1, k_b1, k_w2, k_b2 = jax.random.split(key, 5)

    # Small shapes consistent with the module: embed_dim = C = 4.
    N, C, H, W = 2, 4, 16, 16
    Ch = C // 2

    x = jax.random.normal(k_x, (N, C, H, W), dtype=jnp.float32)

    # Deterministic synthetic parameters (Conv2d 1x1 weights, squeezed to 2D).
    w1 = jax.random.normal(k_w1, (Ch, C), dtype=jnp.float32) * 0.5
    b1 = jax.random.normal(k_b1, (Ch,), dtype=jnp.float32) * 0.1
    w2 = jax.random.normal(k_w2, (C, Ch), dtype=jnp.float32) * 0.5
    b2 = jax.random.normal(k_b2, (C,), dtype=jnp.float32) * 0.1

    out = channel_attn_pallas(x, w1, b1, w2, b2)
    out = jax.block_until_ready(out)

    ref = channel_attn_reference(x, w1, b1, w2, b2)
    assert out.shape == (N, C, H, W)
    assert jnp.allclose(out, ref, atol=1e-5, rtol=1e-5), (
        float(jnp.max(jnp.abs(out - ref))))

    print("KERNEL_OK")
</pallas_src>

<mosaic_0001>
module attributes {stable_mosaic.version = 11 : i64} {
  func.func @_pool_kernel(%arg0: i32, %arg1: i32, %arg2: memref<1x4x256xf32, #tpu.memory_space<vmem>>, %arg3: memref<1x4x1xf32, #tpu.memory_space<vmem>>, %arg4: memref<4x1xf32, #tpu.memory_space<vmem>>) attributes {dimension_semantics = [#tpu.dimension_semantics<parallel>, #tpu.dimension_semantics<arbitrary>], iteration_bounds = array<i64: 2, 1>, scalar_prefetch = 0 : i64, scratch_operands = 1 : i64, tpu.core_type = #tpu.core_type<tc>, window_params = [{transform_indices = @transform_0, window_bounds = array<i64: 1, 4, 256>}, {transform_indices = @transform_1, window_bounds = array<i64: 1, 4, 1>}]} {
    %c0_i32 = arith.constant 0 : i32
    %0 = arith.cmpi eq, %arg1, %c0_i32 : i32
    %1 = arith.extui %0 : i1 to i32
    %c0_i32_0 = arith.constant 0 : i32
    %2 = arith.cmpi ne, %1, %c0_i32_0 : i32
    scf.if %2 {
      %cst_9 = arith.constant 0.000000e+00 : f32
      %13 = vector.broadcast %cst_9 : f32 to vector<4x1xf32>
      %c0_10 = arith.constant 0 : index
      %c0_11 = arith.constant 0 : index
      %14 = vector.load %arg4[%c0_10, %c0_11] : memref<4x1xf32, #tpu.memory_space<vmem>>, vector<4x1xf32>
      tpu.vector_store %arg4[%c0_10, %c0_11], %13 {strides = array<i32>} : memref<4x1xf32, #tpu.memory_space<vmem>>, vector<4x1xf32>,
    } else {
    }
    %c0 = arith.constant 0 : index
    %c0_1 = arith.constant 0 : index
    %c0_2 = arith.constant 0 : index
    %3 = vector.load %arg2[%c0, %c0_1, %c0_2] : memref<1x4x256xf32, #tpu.memory_space<vmem>>, vector<1x4x256xf32>
    %4 = vector.shape_cast %3 : vector<1x4x256xf32> to vector<4x256xf32>
    %c0_3 = arith.constant 0 : index
    %c0_4 = arith.constant 0 : index
    %5 = vector.load %arg4[%c0_3, %c0_4] : memref<4x1xf32, #tpu.memory_space<vmem>>, vector<4x1xf32>
    %cst = arith.constant dense<0.000000e+00> : vector<4xf32>
    %6 = vector.multi_reduction <add>, %4, %cst [1] : vector<4x256xf32> to vector<4xf32>
    %7 = vector.shape_cast %6 : vector<4xf32> to vector<4x1xf32>
    %8 = arith.addf %5, %7 : vector<4x1xf32>
    %c0_5 = arith.constant 0 : index
    %c0_6 = arith.constant 0 : index
    %9 = vector.load %arg4[%c0_5, %c0_6] : memref<4x1xf32, #tpu.memory_space<vmem>>, vector<4x1xf32>
    tpu.vector_store %arg4[%c0_5, %c0_6], %8 {strides = array<i32>} : memref<4x1xf32, #tpu.memory_space<vmem>>, vector<4x1xf32>,
    %c0_i32_7 = arith.constant 0 : i32
    %10 = arith.cmpi eq, %arg1, %c0_i32_7 : i32
    %11 = arith.extui %10 : i1 to i32
    %c0_i32_8 = arith.constant 0 : i32
    %12 = arith.cmpi ne, %11, %c0_i32_8 : i32
    scf.if %12 {
      %c0_9 = arith.constant 0 : index
      %c0_10 = arith.constant 0 : index
      %13 = vector.load %arg4[%c0_9, %c0_10] : memref<4x1xf32, #tpu.memory_space<vmem>>, vector<4x1xf32>
      %c0_11 = arith.constant 0 : index
      %c0_12 = arith.constant 0 : index
      %c0_13 = arith.constant 0 : index
      %14 = vector.load %arg3[%c0_11, %c0_12, %c0_13] : memref<1x4x1xf32, #tpu.memory_space<vmem>>, vector<1x4x1xf32>
      %15 = vector.shape_cast %14 : vector<1x4x1xf32> to vector<4x1xf32>
      %16 = vector.shape_cast %13 : vector<4x1xf32> to vector<1x4x1xf32>
      tpu.vector_store %arg3[%c0_11, %c0_12, %c0_13], %16 {strides = array<i32>} : memref<1x4x1xf32, #tpu.memory_space<vmem>>, vector<1x4x1xf32>,
    } else {
    }
    return
  }
  func.func @transform_0(%arg0: i32, %arg1: i32) -> (i32, i32, i32) {
    %c0_i32 = arith.constant 0 : i32
    %c0_i32_0 = arith.constant 0 : i32
    return %arg0, %c0_i32, %arg1 : i32, i32, i32
  }
  func.func @transform_1(%arg0: i32, %arg1: i32) -> (i32, i32, i32) {
    %c0_i32 = arith.constant 0 : i32
    %c0_i32_0 = arith.constant 0 : i32
    %c0_i32_1 = arith.constant 0 : i32
    return %arg0, %c0_i32, %c0_i32_0 : i32, i32, i32
  }
}

</mosaic_0001>

<bundles_post_ra>
// kernel: tpu_custom_call.1
= control target key start
LH: loop header
LB: loop body
LE: loop exit
PB: predicated region body
PF: predicated region fallthrough
CT: control target
= control target key end

     0   :  { %6 = vsyncpa [#allocation4], 0  ;;  %s543_s0 = inlined_call_operand.hbm [shape: f32[2,4,256], index: 0, kind: input, shape index: {}]   ;;  %s544_s1 = inlined_call_operand.vmem [shape: f32[2,4,1], index: 1, kind: output, shape index: {}]  }
   0x1   :  { %8 = vsyncpa [#allocation4 + $0x1], 0  ;;  %s415_s6 = smov 0   ;;  %s417_s7 = smov 0  }
   0x2   :  { %s419_s8 = smov 0   ;;  %s421_s9 = smov 0  }
   0x3   :  { %s423_s10 = smov 0   ;;  %s425_s11 = smov 0  }
   0x4 LB: > { %s251_s12 = sadd.s32 4294967295, %s401_s11   ;;  %s26_s13 = sadd.s32 1, %s397_s10  ;;  %s401_s11 = sphi %s425_s11, %s14_s11   ;;  %s397_s10 = sphi %s423_s10, %s554_s10   ;;  %s393_s9 = sphi %s421_s9, %s553_s9   ;;  %s389_s8 = sphi %s419_s8, %s552_s8   ;;  %s385_s7 = sphi %s417_s7, %s551_s7   ;;  %s381_s6 = sphi %s415_s6, %s550_s6  }
   0x5   : > { %p28_p0 = scmp.ge.s32.totalorder %s26_s13, 2  ;;  %s35_s14 = sadd.s32 1, %s389_s8 }
   0x6   : > { %p42_p1 = scmp.ne.s32.totalorder %s389_s8, %s385_s7  ;;  %p43_p2 = scmp.eq.s32.totalorder %s401_s11, 0 }
   0x7   : > { %s556_s13 = smov (%p28_p0, %s26_s13), 0  ;;  %p48_p4 = scmp.ne.s32.totalorder %s385_s7, %s381_s6 }
   0x8   : > { %p451_p3 = por %p43_p2, %p42_p1  ;;  %s30_s16 = ssub.s32 %s397_s10, %s556_s13 }
   0x9   : > { %p49_p5 = scmp.eq.s32.totalorder %s251_s12, 0  ;;  %p33_p6 = scmp.eq.s32.totalorder %s30_s16, 0 }
   0xa   : > { %p270_p8 = scmp.lt.s32.totalorder %s401_s11, 2  ;;  %s98_s19 = sand.u32 1, %s389_s8  }
   0xb   : > { %p458_p7 = por %p49_p5, %p48_p4  ;;  %s263_s20 = sshll.u32 %s397_s10, 7 }
   0xc   : > { %s464_s18 = scalar_select %p33_p6, %s389_s8, %s35_s14  }
   0xd   : > { %s255_s21 = sshll.u32 %s98_s19, 3  ;;  %s471_s24 = scalar_lea.hbm %s543_s0, %s263_s20 }
   0xe   : > { %s102_s25 = scalar_lea.vmem [#allocation3], %s255_s21  ;;  %p475_p9 = pnand %p270_p8, %p451_p3 }
   0xf   : > { %s112_s26 = sshll.u32 %s102_s25, 4  ;;  %s99_s28 = scalar_lea.sflag [#allocation4], %s98_s19  ;;  %s479_s26 = int_to_ptr.vmem [resolvable:$true] %s112_s26 }
  0x10   : > { %s321_s29 = scalar_lea.hbm %s471_s24, 128  ;;  %p323_p13 = pneg %p475_p9 }
  0x11   : > { %p322_p12 = scmp.ne.s32.totalorder %s471_s24, %s321_s29  ;;  %s326_s3 = scalar_lea.hbm %s543_s0, 256 }
  0x12   : > { %p327_p2 = scmp.lt.u32.totalorder %s471_s24, %s543_s0  ;;  %p328_p3 = scmp.lt.u32.totalorder %s326_s3, %s321_s29 }
  0x13   : > { %p324_p0 = pnand %p323_p13, %p322_p12  ;;  %p330_p5 = scmp.lt.u32.totalorder %s321_s29, %s471_s24 }
  0x14   : > { %p329_p4 = por %p328_p3, %p327_p2 }
  0x15   : > { %p325_p1 = pneg %p324_p0 }
  0x16   : > { %p331_p6 = por %p330_p5, %p329_p4 }
  0x18   : > { %p332_p8 = pnand %p331_p6, %p325_p1 }
  0x1a   : > { %335 = shalt.err (!%p332_p8)
}
  0x1b   : > { %s336_s6 = scalar_lea.vmem %s479_s26, 128  ;;  %s403_s12 = smov [#allocation3]  }
  0x1c   : > { %p337_p12 = scmp.ne.s32.totalorder %s479_s26, %s336_s6  ;;  %s341_s14 = sshll.u32 %s403_s12, 4  ;;  %s342_s14 = int_to_ptr.vmem [resolvable:$false] %s341_s14 }
  0x1d   : > { %s343_s15 = scalar_lea.vmem %s342_s14, 256  ;;  %p344_p11 = scmp.lt.s32.totalorder %s479_s26, %s342_s14 }
  0x1e   : > { %p339_p0 = pnand %p337_p12, %p323_p13  ;;  %p345_p2 = scmp.lt.s32.totalorder %s343_s15, %s336_s6 }
  0x20   : > { %p340_p10 = pneg %p339_p0  ;;  %p346_p3 = por %p345_p2, %p344_p11 }
  0x22   : > { %p347_p4 = pnand %p346_p3, %p340_p10 }
  0x24   : > { %350 = shalt.err (!%p347_p4)
}
  0x25   : > { %269 = dma.hbm_to_vmem [thread:$0]  (!%p475_p9), %s471_s24, 128, %s479_s26, %s99_s28  }
  0x26   : > { %p548_p1 = scmp.lt.s32.totalorder %s401_s11, 3  ;;  %p549_p5 = scmp.ge.s32.totalorder %s401_s11, 1 }
  0x28   : > { %p118_p13 = pnand %p549_p5, %p548_p1 }
  0x29   : > { %s123_s16 = sand.u32 (!%p118_p13), 1, %s385_s7  }
  0x2a   : > { %121 = sbr.rel (%p118_p13) target bundleno = 209 (0xd1), region = 24  ;;  %s259_s19 = sshll.u32 (!%p118_p13), %s123_s16, 3 }
  0x2b   : > { %s124_s20 = scalar_lea.sflag (!%p118_p13), [#allocation4], %s123_s16  ;;  %s127_s21 = scalar_lea.vmem (!%p118_p13), [#allocation3], %s259_s19 }
  0x31   : > { %376 = dma.done.wait (%p458_p7), %s124_s20, 128  }
  0x32   : > { %378 = vsyncadd (%p458_p7), %s124_s20, 4294967168  ;;  %vm154_vm0 = vcmask 3072   ;;  %v404_v0 = vmov 0.0   ;;  %vm161_vm1 = vcmask 1043456   ;;  %v156_v1 = vld [vmem:[%s127_s21] sm:$0xff]  ;;  %p146_p9 = scmp.lt.s32.totalorder %s393_s9, 1 }
  0x33   : > { %155 = vst.msk [vmem:[#allocation2] sm:$0xf] %vm154_vm0, %v404_v0  ;;  %v159_v2 = vcombine.high %v156_v1, %v156_v1  ;;  %v162_v3 = vsel %vm161_vm1, %v156_v1, 0.0 }
  0x34   : > { %s558_s9 = smov (!%p146_p9, %s393_s9), 1 }
  0x35   : > { %v163_v4 = vsel %vm161_vm1, %v159_v2, 0.0  ;;  %s260_s17 = sshll.u32 %s558_s9, 2 }
  0x36   : > { %v164_v5 = vadd.f32 %v163_v4, %v162_v3  ;;  %s149_s24 = scalar_lea.vmem %s544_s1, %s260_s17 }
  0x38   : > { %165 = vadd.xlane.f32.xlu0 %v164_v5 }
  0x3a   : > { %v157_v6 = vld [vmem:[#allocation2] sm:$0xf] }
  0xc5   : > { %v166_v7 = vpop.xlane.xlu0 %165 }
  0xc6   : > { %v167_v8 = vadd.f32 %v166_v7, %v157_v6 }
  0xc8   : > { %169 = vst.msk [vmem:[#allocation2] sm:$0xf] %vm154_vm0, %v167_v8 }
  0xcf   : > { %v173_v9 = vld [vmem:[#allocation2] sm:$0xf] }
  0xd0   : > { %174 = vst.msk [vmem:[%s149_s24] sm:$0xf] %vm154_vm0, %v173_v9 }
  0xd1 PF: > { %s14_s11 = sadd.s32 1, %s401_s11   ;;  %s550_s6 = smov %s385_s7 }
  0xd2   : > { %p11_p7 = scmp.ge.s32.totalorder %s14_s11, 4   ;;  %s551_s7 = smov %s389_s8 }
  0xd3   : > { %s552_s8 = smov %s464_s18  ;;  %s553_s9 = smov %s397_s10 }
  0xd4   : > { %s554_s10 = smov %s556_s13  ;;  %13 = sbr.rel (!%p11_p7) target bundleno = 4 (0x4), region = 72 }
  0xdb   :  { %194 = vsyncpa [#allocation4], 1 }
  0xdc   :  { %196 = vsyncpa [#allocation4 + $0x1], 1 }

</bundles_post_ra>
